<compile_context>
chip_gen: v5e
topology: v5e:2x2
jax: 0.10.0
libtpu: 0.0.40
codegen_flags: <defaults>
</compile_context>

<pallas_src>
import jax
import jax.numpy as jnp
from jax.experimental import pallas as pl
from jax.experimental.pallas import tpu as pltpu

_LANES = 128


def _round_up(n, m):
    return ((n + m - 1) // m) * m


def _pick_batch_tile(B):
    """Batch tile: sublane-aligned, capped at 256 rows (v6e/v7x MXU M dim),
    and (for B >= 16) chosen so the 'parallel' batch axis has >= 2 grid steps
    and can shard across v7x's two TensorCores."""
    if B < 16:
        return B
    return min(256, _round_up(pl.cdiv(B, 2), 8))


def _vmem_limit_bytes(In, Hp, TB):
    """Scoped-VMEM request: single-buffered packed weights + double-buffered
    activation tiles + f32 gates temp, with headroom. Floor 32 MiB (>= v6e/v7x
    default, above v5e's 16 MiB default), cap 64 MiB (v7x physical)."""
    w_bytes = (In + Hp) * 3 * Hp * 2 + 3 * Hp * 4          # bf16 W_x/W_a + f32 bias
    act_in = TB * In * 2 + TB * Hp * 2 + TB * Hp * 4       # x bf16, a bf16, c f32
    act_out = TB * Hp * 4 + TB * Hp * 2                    # c f32, a bf16
    tmp = TB * 3 * Hp * 4 * 2                              # f32 gates + slices
    total = w_bytes + 2 * (act_in + act_out) + tmp
    return min(64 << 20, max(32 << 20, 2 * total + (4 << 20)))


def _lstm_cell_kernel(x_ref, a_ref, c_ref, wx_ref, wa_ref, b_ref,
                      c_out_ref, a_out_ref):
    """One fused LSTM-cell step for a (TB, Hp) batch tile.

    Packed gate layout along the 3*Hp lane dim:
      [0:Hp)    -> "hidden" projection -> cdash = tanh(.)
      [Hp:2Hp)  -> "update" projection -> fu    = sigmoid(.)
      [2Hp:3Hp) -> "forget" projection -> ff    = sigmoid(.)  (also reused as fo)
    x/a arrive as bf16 (MXU operands); accumulation and gate math are f32.
    """
    hp = c_ref.shape[-1]

    gates = (
        jnp.dot(x_ref[...], wx_ref[...], preferred_element_type=jnp.float32)
        + jnp.dot(a_ref[...], wa_ref[...], preferred_element_type=jnp.float32)
        + b_ref[...]
    )

    cdash = jnp.tanh(gates[:, :hp])
    fu = jax.nn.sigmoid(gates[:, hp:2 * hp])
    ff = jax.nn.sigmoid(gates[:, 2 * hp:])
    fo = ff  # intentional: reference module reuses self.forget for the output gate

    c = fu * cdash + ff * c_ref[...]
    a = fo * jnp.tanh(c)

    c_out_ref[...] = c
    a_out_ref[...] = a.astype(a_out_ref.dtype)


def _lstm_seq_kernel(x_ref, a0_ref, c0_ref, wx_ref, wa_ref, b_ref,
                     c_ref, a_ref):
    """T timesteps folded into the grid: t is the inner ("arbitrary") axis.

    The output refs (c_ref f32, a_ref bf16) are VMEM-resident across the t
    axis (constant block index) and carry the recurrent state — a/c never
    round-trip HBM between steps; weights stay resident for the whole run.
    """
    hp = c_ref.shape[-1]

    @pl.when(pl.program_id(1) == 0)
    def _():
        c_ref[...] = c0_ref[...]
        a_ref[...] = a0_ref[...]

    gates = (
        jnp.dot(x_ref[...], wx_ref[...], preferred_element_type=jnp.float32)
        + jnp.dot(a_ref[...], wa_ref[...], preferred_element_type=jnp.float32)
        + b_ref[...]
    )

    cdash = jnp.tanh(gates[:, :hp])
    fu = jax.nn.sigmoid(gates[:, hp:2 * hp])
    ff = jax.nn.sigmoid(gates[:, 2 * hp:])
    fo = ff

    c = fu * cdash + ff * c_ref[...]
    a = fo * jnp.tanh(c)

    c_ref[...] = c
    a_ref[...] = a.astype(a_ref.dtype)


def _weight_specs(In, Hp, n_grid_args):
    """BlockSpecs for the grid-invariant packed weights/bias: single-buffered
    (the default double-buffer would just be a dead second copy)."""
    if n_grid_args == 1:
        const = lambda i: (0, 0)
    else:
        const = lambda i, t: (0, 0)
    return [
        pl.BlockSpec((In, 3 * Hp), const, pipeline_mode=pl.Buffered(1)),   # W_x
        pl.BlockSpec((Hp, 3 * Hp), const, pipeline_mode=pl.Buffered(1)),   # W_a
        pl.BlockSpec((1, 3 * Hp), const, pipeline_mode=pl.Buffered(1)),    # bias
    ]


def lstm_cell_forward(x, h_state, packed):
    """Pallas-backed equivalent of LSTMCell.forward.

    Returns (c, a) of shape (B, H); c is f32, a is bf16 (lane-dense recurrent
    activation — feed it straight back in for the next step).
    Note: the (padded) c_t buffer is donated to the c output via aliasing.
    """
    c_t, a_t = h_state
    B, In = x.shape
    H = packed["hidden_size"]
    Hp = packed["w_a"].shape[0]
    w_x, w_a, b = packed["w_x"], packed["w_a"], packed["b"]

    pad = Hp - H
    c_p = jnp.pad(c_t, ((0, 0), (0, pad))) if pad else c_t
    a_p = jnp.pad(a_t, ((0, 0), (0, pad))) if pad else a_t
    # bf16 MXU operands: cast once in the wrapper (halves their HBM traffic).
    x_b = x.astype(jnp.bfloat16)
    a_b = a_p.astype(jnp.bfloat16)

    TB = _pick_batch_tile(B)
    grid = (pl.cdiv(B, TB),)

    c_p_out, a_p_out = pl.pallas_call(
        _lstm_cell_kernel,
        grid=grid,
        in_specs=[
            pl.BlockSpec((TB, In), lambda i: (i, 0)),        # x   (bf16)
            pl.BlockSpec((TB, Hp), lambda i: (i, 0)),        # a_t (bf16, padded)
            pl.BlockSpec((TB, Hp), lambda i: (i, 0)),        # c_t (f32,  padded)
        ] + _weight_specs(In, Hp, 1),
        out_specs=(
            pl.BlockSpec((TB, Hp), lambda i: (i, 0)),        # c
            pl.BlockSpec((TB, Hp), lambda i: (i, 0)),        # a
        ),
        out_shape=(
            jax.ShapeDtypeStruct((B, Hp), jnp.float32),
            jax.ShapeDtypeStruct((B, Hp), jnp.bfloat16),
        ),
        # Reuse the (wrapper-local, padded) c_t buffer for the c output.
        input_output_aliases={2: 0},
        compiler_params=pltpu.CompilerParams(
            dimension_semantics=("parallel",),
            vmem_limit_bytes=_vmem_limit_bytes(In, Hp, TB)),
    )(x_b, a_b, c_p, w_x, w_a, b)

    if pad:
        return c_p_out[:, :H], a_p_out[:, :H]
    return c_p_out, a_p_out


def lstm_sequence_forward(x_seq, h_state, packed):
    """Apply the LSTM cell over x_seq of shape (T, B, In) in ONE pallas_call.

    Equivalent to looping lstm_cell_forward over t, but the weights stay
    resident in VMEM for all T steps and the recurrent a/c state never
    round-trips HBM. Returns the final (c, a) (c f32, a bf16), shape (B, H).
    """
    c_t, a_t = h_state
    T, B, In = x_seq.shape
    H = packed["hidden_size"]
    Hp = packed["w_a"].shape[0]
    w_x, w_a, b = packed["w_x"], packed["w_a"], packed["b"]

    pad = Hp - H
    c_p = jnp.pad(c_t, ((0, 0), (0, pad))) if pad else c_t
    a_p = jnp.pad(a_t, ((0, 0), (0, pad))) if pad else a_t
    x_b = x_seq.astype(jnp.bfloat16)
    a_b = a_p.astype(jnp.bfloat16)

    TB = _pick_batch_tile(B)
    grid = (pl.cdiv(B, TB), T)   # t innermost => sequential carry per batch tile

    c_p_out, a_p_out = pl.pallas_call(
        _lstm_seq_kernel,
        grid=grid,
        in_specs=[
            pl.BlockSpec((None, TB, In), lambda i, t: (t, i, 0)),  # x_t (bf16)
            pl.BlockSpec((TB, Hp), lambda i, t: (i, 0)),           # a0  (bf16)
            pl.BlockSpec((TB, Hp), lambda i, t: (i, 0)),           # c0  (f32)
        ] + _weight_specs(In, Hp, 2),
        out_specs=(
            pl.BlockSpec((TB, Hp), lambda i, t: (i, 0)),           # final c
            pl.BlockSpec((TB, Hp), lambda i, t: (i, 0)),           # final a
        ),
        out_shape=(
            jax.ShapeDtypeStruct((B, Hp), jnp.float32),
            jax.ShapeDtypeStruct((B, Hp), jnp.bfloat16),
        ),
        compiler_params=pltpu.CompilerParams(
            dimension_semantics=("parallel", "arbitrary"),
            vmem_limit_bytes=_vmem_limit_bytes(In, Hp, TB)),
    )(x_b, a_b, c_p, w_x, w_a, b)

    if pad:
        return c_p_out[:, :H], a_p_out[:, :H]
    return c_p_out, a_p_out


def init_params(key, input_size, hidden_size):
    """Torch-equivalent nn.Linear params, stored transposed as (D, H), f32."""
    D = input_size + hidden_size
    H = hidden_size
    bound = 1.0 / jnp.sqrt(jnp.float32(D))
    names = ["update", "forget", "output", "hidden"]
    keys = jax.random.split(key, 2 * len(names))
    params = {}
    for i, name in enumerate(names):
        w = jax.random.uniform(keys[2 * i], (D, H), jnp.float32, -bound, bound)
        b = jax.random.uniform(keys[2 * i + 1], (1, H), jnp.float32, -bound, bound)
        params[name] = (w, b)
    return params


def pack_params(params, input_size, hidden_size):
    """Pack the three used gates [hidden, update, forget] into lane-dense weights.

    - Columns padded per-gate from H to Hp = round_up(H, 128) (unmasked stores).
    - Rows split at input_size so the kernel does x @ W_x + a_t @ W_a (no concat);
      W_a rows padded to Hp to match the lane-dense recurrent state.
    - Weights stored bf16 (MXU operands); bias kept f32 (added post-accumulate).
    - params["output"] exists (as in the torch module) but is unused in forward.
    """
    H = hidden_size
    Hp = _round_up(H, _LANES)
    gate_names = ["hidden", "update", "forget"]

    wx_cols, wa_cols, b_cols = [], [], []
    for name in gate_names:
        w, b = params[name]
        w_pad = jnp.pad(w, ((0, 0), (0, Hp - H)))                       # (D, Hp)
        wx_cols.append(w_pad[:input_size, :])                           # (In, Hp)
        wa_cols.append(jnp.pad(w_pad[input_size:, :],                   # (Hp, Hp)
                               ((0, Hp - H), (0, 0))))
        b_cols.append(jnp.pad(b, ((0, 0), (0, Hp - H))))                # (1, Hp)

    return {
        "hidden_size": H,
        "w_x": jnp.concatenate(wx_cols, axis=1).astype(jnp.bfloat16),   # (In, 3Hp)
        "w_a": jnp.concatenate(wa_cols, axis=1).astype(jnp.bfloat16),   # (Hp, 3Hp)
        "b": jnp.concatenate(b_cols, axis=1),                           # (1, 3Hp) f32
    }


def _reference_forward(x, h_state, params):
    """Pure-JAX f32 reference (mirrors the torch code, including the fo==ff quirk)."""
    c_t, a_t = h_state
    combine = jnp.concatenate([x, a_t], axis=1)
    w_h, b_h = params["hidden"]
    w_u, b_u = params["update"]
    w_f, b_f = params["forget"]
    cdash = jnp.tanh(combine @ w_h + b_h)
    fu = jax.nn.sigmoid(combine @ w_u + b_u)
    ff = jax.nn.sigmoid(combine @ w_f + b_f)
    fo = jax.nn.sigmoid(combine @ w_f + b_f)
    c = fu * cdash + ff * c_t
    a = fo * jnp.tanh(c)
    return c, a


if __name__ == "__main__":
    B, INPUT, HIDDEN, T = 8, 16, 32, 8

    key = jax.random.PRNGKey(0)
    k_params, k_x, k_c, k_a, k_xs = jax.random.split(key, 5)

    params = init_params(k_params, INPUT, HIDDEN)
    packed = pack_params(params, INPUT, HIDDEN)

    x = jax.random.normal(k_x, (B, INPUT), jnp.float32)
    c0 = jax.random.normal(k_c, (B, HIDDEN), jnp.float32)
    a0 = jax.random.normal(k_a, (B, HIDDEN), jnp.float32)

    # --- single cell step (matches LSTMCell.forward) ---
    c, a = lstm_cell_forward(x, (c0, a0), packed)
    jax.block_until_ready((c, a))

    c_ref, a_ref = _reference_forward(x, (c0, a0), params)
    # bf16 matmul operands / bf16 a output vs f32 reference -> loosened tolerance.
    assert jnp.allclose(c, c_ref, atol=2e-2, rtol=2e-2), "c mismatch vs reference"
    assert jnp.allclose(a.astype(jnp.float32), a_ref, atol=2e-2, rtol=2e-2), \
        "a mismatch vs reference"

    # --- T timesteps folded into one pallas_call ---
    x_seq = jax.random.normal(k_xs, (T, B, INPUT), jnp.float32)
    c_T, a_T = lstm_sequence_forward(x_seq, (c0, a0), packed)
    jax.block_until_ready((c_T, a_T))

    c_r, a_r = c0, a0
    for t in range(T):
        c_r, a_r = _reference_forward(x_seq[t], (c_r, a_r), params)
    # Structural check: bf16 weight/activation rounding compounds over T steps,
    # so compare against the f32 reference with a loose tolerance.
    assert jnp.allclose(c_T, c_r, atol=1e-1, rtol=1e-1), "seq c mismatch vs reference"
    assert jnp.allclose(a_T.astype(jnp.float32), a_r, atol=1e-1, rtol=1e-1), \
        "seq a mismatch vs reference"

    print("KERNEL_OK")
</pallas_src>

<mosaic_0001>
module attributes {stable_mosaic.version = 11 : i64} {
  func.func @_lstm_cell_kernel(%arg0: i32, %arg1: memref<8x16xbf16, #tpu.memory_space<vmem>>, %arg2: memref<8x128xbf16, #tpu.memory_space<vmem>>, %arg3: memref<8x128xf32, #tpu.memory_space<vmem>>, %arg4: memref<16x384xbf16, #tpu.memory_space<vmem>>, %arg5: memref<128x384xbf16, #tpu.memory_space<vmem>>, %arg6: memref<1x384xf32, #tpu.memory_space<vmem>>, %arg7: memref<8x128xf32, #tpu.memory_space<vmem>>, %arg8: memref<8x128xbf16, #tpu.memory_space<vmem>>) attributes {dimension_semantics = [#tpu.dimension_semantics<parallel>], iteration_bounds = array<i64: 1>, scalar_prefetch = 0 : i64, scratch_operands = 0 : i64, tpu.core_type = #tpu.core_type<tc>, window_params = [{transform_indices = @transform_0, window_bounds = array<i64: 8, 16>}, {transform_indices = @transform_1, window_bounds = array<i64: 8, 128>}, {transform_indices = @transform_2, window_bounds = array<i64: 8, 128>}, {pipeline_mode = #tpu.pipeline_mode<synchronous>, transform_indices = @transform_3, window_bounds = array<i64: 16, 384>}, {pipeline_mode = #tpu.pipeline_mode<synchronous>, transform_indices = @transform_4, window_bounds = array<i64: 128, 384>}, {pipeline_mode = #tpu.pipeline_mode<synchronous>, transform_indices = @transform_5, window_bounds = array<i64: 1, 384>}, {transform_indices = @transform_6, window_bounds = array<i64: 8, 128>}, {transform_indices = @transform_7, window_bounds = array<i64: 8, 128>}]} {
    %c0 = arith.constant 0 : index
    %c0_0 = arith.constant 0 : index
    %0 = vector.load %arg1[%c0, %c0_0] : memref<8x16xbf16, #tpu.memory_space<vmem>>, vector<8x16xbf16>
    %c0_1 = arith.constant 0 : index
    %c0_2 = arith.constant 0 : index
    %1 = vector.load %arg4[%c0_1, %c0_2] : memref<16x384xbf16, #tpu.memory_space<vmem>>, vector<16x384xbf16>
    %cst = arith.constant dense<0.000000e+00> : vector<8x384xf32>
    %2 = tpu.matmul %0, %1, %cst {dimension_numbers = #tpu.dot_dimension_numbers<[1], [0], [0], [1], [0, 0, 1, 1], [], []>} : vector<8x16xbf16>, vector<16x384xbf16>, vector<8x384xf32> -> vector<8x384xf32>
    %c0_3 = arith.constant 0 : index
    %c0_4 = arith.constant 0 : index
    %3 = vector.load %arg2[%c0_3, %c0_4] : memref<8x128xbf16, #tpu.memory_space<vmem>>, vector<8x128xbf16>
    %c0_5 = arith.constant 0 : index
    %c0_6 = arith.constant 0 : index
    %4 = vector.load %arg5[%c0_5, %c0_6] : memref<128x384xbf16, #tpu.memory_space<vmem>>, vector<128x384xbf16>
    %cst_7 = arith.constant dense<0.000000e+00> : vector<8x384xf32>
    %5 = tpu.matmul %3, %4, %cst_7 {dimension_numbers = #tpu.dot_dimension_numbers<[1], [0], [0], [1], [0, 0, 1, 1], [], []>} : vector<8x128xbf16>, vector<128x384xbf16>, vector<8x384xf32> -> vector<8x384xf32>
    %6 = arith.addf %2, %5 : vector<8x384xf32>
    %c0_8 = arith.constant 0 : index
    %c0_9 = arith.constant 0 : index
    %7 = vector.load %arg6[%c0_8, %c0_9] : memref<1x384xf32, #tpu.memory_space<vmem>>, vector<1x384xf32>
    %8 = vector.broadcast %7 : vector<1x384xf32> to vector<8x384xf32>
    %9 = arith.addf %6, %8 : vector<8x384xf32>
    %10 = vector.extract_strided_slice %9 {offsets = [0, 0], sizes = [8, 128], strides = [1, 1]} : vector<8x384xf32> to vector<8x128xf32>
    %11 = math.tanh %10 : vector<8x128xf32>
    %12 = vector.extract_strided_slice %9 {offsets = [0, 128], sizes = [8, 128], strides = [1, 1]} : vector<8x384xf32> to vector<8x128xf32>
    %13 = arith.negf %12 : vector<8x128xf32>
    %14 = math.exp %13 : vector<8x128xf32>
    %cst_10 = arith.constant 1.000000e+00 : f32
    %15 = vector.broadcast %cst_10 : f32 to vector<8x128xf32>
    %16 = arith.addf %15, %14 : vector<8x128xf32>
    %17 = arith.divf %15, %16 : vector<8x128xf32>
    %18 = vector.extract_strided_slice %9 {offsets = [0, 256], sizes = [8, 128], strides = [1, 1]} : vector<8x384xf32> to vector<8x128xf32>
    %19 = arith.negf %18 : vector<8x128xf32>
    %20 = math.exp %19 : vector<8x128xf32>
    %cst_11 = arith.constant 1.000000e+00 : f32
    %21 = vector.broadcast %cst_11 : f32 to vector<8x128xf32>
    %22 = arith.addf %21, %20 : vector<8x128xf32>
    %23 = arith.divf %21, %22 : vector<8x128xf32>
    %24 = arith.mulf %17, %11 : vector<8x128xf32>
    %c0_12 = arith.constant 0 : index
    %c0_13 = arith.constant 0 : index
    %25 = vector.load %arg3[%c0_12, %c0_13] : memref<8x128xf32, #tpu.memory_space<vmem>>, vector<8x128xf32>
    %26 = arith.mulf %23, %25 : vector<8x128xf32>
    %27 = arith.addf %24, %26 : vector<8x128xf32>
    %28 = math.tanh %27 : vector<8x128xf32>
    %29 = arith.mulf %23, %28 : vector<8x128xf32>
    %c0_14 = arith.constant 0 : index
    %c0_15 = arith.constant 0 : index
    %30 = vector.load %arg7[%c0_14, %c0_15] : memref<8x128xf32, #tpu.memory_space<vmem>>, vector<8x128xf32>
    tpu.vector_store %arg7[%c0_14, %c0_15], %27 {strides = array<i32>} : memref<8x128xf32, #tpu.memory_space<vmem>>, vector<8x128xf32>,
    %31 = arith.truncf %29 : vector<8x128xf32> to vector<8x128xbf16>
    %c0_16 = arith.constant 0 : index
    %c0_17 = arith.constant 0 : index
    %32 = vector.load %arg8[%c0_16, %c0_17] : memref<8x128xbf16, #tpu.memory_space<vmem>>, vector<8x128xbf16>
    tpu.vector_store %arg8[%c0_16, %c0_17], %31 {strides = array<i32>} : memref<8x128xbf16, #tpu.memory_space<vmem>>, vector<8x128xbf16>,
    return
  }
  func.func @transform_0(%arg0: i32) -> (i32, i32) {
    %c0_i32 = arith.constant 0 : i32
    %c0_i32_0 = arith.constant 0 : i32
    return %arg0, %c0_i32 : i32, i32
  }
  func.func @transform_1(%arg0: i32) -> (i32, i32) {
    %c0_i32 = arith.constant 0 : i32
    %c0_i32_0 = arith.constant 0 : i32
    return %arg0, %c0_i32 : i32, i32
  }
  func.func @transform_2(%arg0: i32) -> (i32, i32) {
    %c0_i32 = arith.constant 0 : i32
    %c0_i32_0 = arith.constant 0 : i32
    return %arg0, %c0_i32 : i32, i32
  }
  func.func @transform_3(%arg0: i32) -> (i32, i32) {
    %c0_i32 = arith.constant 0 : i32
    %c0_i32_0 = arith.constant 0 : i32
    %c0_i32_1 = arith.constant 0 : i32
    return %c0_i32, %c0_i32_0 : i32, i32
  }
  func.func @transform_4(%arg0: i32) -> (i32, i32) {
    %c0_i32 = arith.constant 0 : i32
    %c0_i32_0 = arith.constant 0 : i32
    %c0_i32_1 = arith.constant 0 : i32
    return %c0_i32, %c0_i32_0 : i32, i32
  }
  func.func @transform_5(%arg0: i32) -> (i32, i32) {
    %c0_i32 = arith.constant 0 : i32
    %c0_i32_0 = arith.constant 0 : i32
    %c0_i32_1 = arith.constant 0 : i32
    return %c0_i32, %c0_i32_0 : i32, i32
  }
  func.func @transform_6(%arg0: i32) -> (i32, i32) {
    %c0_i32 = arith.constant 0 : i32
    %c0_i32_0 = arith.constant 0 : i32
    return %arg0, %c0_i32 : i32, i32
  }
  func.func @transform_7(%arg0: i32) -> (i32, i32) {
    %c0_i32 = arith.constant 0 : i32
    %c0_i32_0 = arith.constant 0 : i32
    return %arg0, %c0_i32 : i32, i32
  }
}

</mosaic_0001>

<bundles_post_ra>
// kernel: tpu_custom_call.1
= control target key start
LH: loop header
LB: loop body
LE: loop exit
PB: predicated region body
PF: predicated region fallthrough
CT: control target
= control target key end

     0   :  { %13 = vsyncpa [#allocation3], 0  ;;  %s796_s0 = inlined_call_operand.vmem [shape: bf16[8,16], index: 0, kind: input, shape index: {}]   ;;  %s797_s1 = inlined_call_operand.vmem [shape: bf16[8,128], index: 1, kind: input, shape index: {}]   ;;  %s798_s2 = inlined_call_operand.hbm [shape: f32[8,128], index: 2, kind: input, shape index: {}, may-alias: {2,6}]   ;;  %s799_s3 = inlined_call_operand.hbm [shape: bf16[16,384], index: 3, kind: input, shape index: {}]   ;;  %s800_s4 = inlined_call_operand.hbm [shape: bf16[128,384], index: 4, kind: input, shape index: {}]   ;;  %s801_s5 = inlined_call_operand.vmem [shape: f32[1,384], index: 5, kind: input, shape index: {}]   ;;  %s802_s6 = inlined_call_operand.hbm [shape: f32[8,128], index: 6, kind: output, shape index: {0}, may-alias: {2,6}]   ;;  %s803_s7 = inlined_call_operand.hbm [shape: bf16[8,128], index: 7, kind: output, shape index: {1}]  }
   0x1   :  { %14 = vsyncpa [#allocation6], 0 }
   0x2   :  { %15 = vsyncpa [#allocation4], 0  ;;  %s36_s26 = sshll.u32 %s799_s3, 4  ;;  %s37_s26 = int_to_ptr.hbm [resolvable:$true] %s36_s26 }
   0x3   :  { %16 = vsyncpa [#allocation10], 0  ;;  %s717_s27 = smov [#allocation5]   ;;  %s26_s8 = sshll.u32 %s798_s2, 4  ;;  %s27_s8 = int_to_ptr.hbm [resolvable:$true] %s26_s8 }
   0x4   :  { %s38_s28 = sshll.u32 %s717_s27, 4  ;;  %s718_s9 = smov 192   ;;  %s39_s28 = int_to_ptr.vmem [resolvable:$true] %s38_s28 }
   0x5   :  { %s719_s10 = smov 12   ;;  %s720_s11 = smov [#allocation2]  }
   0x6   :  { %44 = dma.hbm_to_vmem [thread:$0]  %s37_s26, 384, %s39_s28, [#allocation6], %s718_s9, %s718_s9, %s719_s10  }
   0x7   :  { %s28_s12 = sshll.u32 %s720_s11, 4  ;;  %s49_s15 = sshll.u32 %s800_s4, 4  ;;  %s29_s12 = int_to_ptr.vmem [resolvable:$true] %s28_s12  ;;  %s50_s15 = int_to_ptr.hbm [resolvable:$true] %s49_s15 }
   0x8   :  { %31 = dma.hbm_to_vmem [thread:$0]  %s27_s8, 128, %s29_s12, [#allocation3]  }
   0x9   :  { %s721_s3 = smov [#allocation7]  }
   0xa   :  { %s51_s16 = sshll.u32 %s721_s3, 4  ;;  %s52_s16 = int_to_ptr.vmem [resolvable:$true] %s51_s16 }
   0xb   :  { %57 = dma.hbm_to_vmem [thread:$0]  %s50_s15, 3072, %s52_s16, [#allocation6], %s718_s9, %s718_s9, %s719_s10  }
   0xc   :  { %709 = dma.done.wait [#allocation3], 128  }
   0xd   :  { %710 = vsyncadd [#allocation3], 4294967168 }
   0xe   :  { %711 = dma.done.wait [#allocation6], 3456  }
   0xf   :  { %712 = vsyncadd [#allocation6], 4294963840  ;;  %v516_v0 = vld [vmem:[#allocation7 + $0xa8] sm:$0xf]  ;;  %v568_v1 = vld [vmem:[#allocation7 + $0xb0] sm:$0xf0] }
  0x10   :  { %v567_v2 = vld [vmem:[#allocation7 + $0xac] sm:$0xf]  ;;  %v517_v3 = vor.u32 %v568_v1, %v516_v0  ;;  %v518_v4 = vld [vmem:[#allocation7 + $0xb4] sm:$0xf0]  ;;  %v524_v5 = vld [vmem:[#allocation7 + $0xb0] sm:$0xf] }
  0x11   :  { %v569_v6 = vld [vmem:[#allocation7 + $0xb8] sm:$0xf0]  ;;  %v521_v7 = vor.u32 %v567_v2, %v518_v4  ;;  %v528_v9 = vld [vmem:[#allocation5] sm:$0xf]  ;;  %v544_v10 = vld [vmem:[#allocation5 + $0x8] sm:$0xf0] }
  0x12   :  { %v525_v8 = vor.u32 %v569_v6, %v524_v5  ;;  %vm294_vm0 = vcmask 130048   ;;  %239 = vmatpush.bf16.msra.mxu0 %v517_v3  ;;  %v529_v11 = vor.u32 %v544_v10, %v528_v9  ;;  %v776_v12 = vld [vmem:[%s796_s0] sm:$0xf]  ;;  %v543_v13 = vld [vmem:[#allocation5 + $0x4] sm:$0xf]  ;;  %s403_s22 = sshll.u32 %s802_s6, 4  ;;  %s404_s22 = int_to_ptr.hbm [resolvable:$true] %s403_s22 }
  0x13   :  { %v530_v14 = vld [vmem:[#allocation5 + $0xc] sm:$0xf0]  ;;  %v504_v15 = vld [vmem:[#allocation7 + $0x90] sm:$0xf]  ;;  %252 = vmatpush.bf16.msra.mxu1 %v521_v7  ;;  %v565_v17 = vld [vmem:[#allocation7 + $0x98] sm:$0xf0] }
  0x14   :  { %265 = vmatpush.bf16.msra.mxu2 %v525_v8  ;;  %v533_v16 = vor.u32 %v543_v13, %v530_v14  ;;  %v564_v18 = vld [vmem:[#allocation7 + $0x94] sm:$0xf]  ;;  %v506_v19 = vld [vmem:[#allocation7 + $0x9c] sm:$0xf0]  ;;  %305 = vmatpush.bf16.msra.mxu3 %v529_v11  ;;  %v505_v20 = vor.u32 %v565_v17, %v504_v15  ;;  %v512_v22 = vld [vmem:[#allocation7 + $0x98] sm:$0xf] }
  0x15   :  { %v509_v21 = vor.u32 %v564_v18, %v506_v19  ;;  %v566_v23 = vld [vmem:[#allocation7 + $0xa0] sm:$0xf0]  ;;  %v492_v24 = vld [vmem:[#allocation7 + $0x78] sm:$0xf]  ;;  %v561_v27 = vld [vmem:[#allocation7 + $0x7c] sm:$0xf] }
  0x16   :  { %v513_v25 = vor.u32 %v566_v23, %v512_v22  ;;  %v562_v26 = vld [vmem:[#allocation7 + $0x80] sm:$0xf0]  ;;  %v494_v28 = vld [vmem:[#allocation7 + $0x84] sm:$0xf0]  ;;  %240 = vmatpush.bf16.msra.mxu0 %v505_v20  ;;  %v500_v30 = vld [vmem:[#allocation7 + $0x80] sm:$0xf] }
  0x17   :  { %v493_v29 = vor.u32 %v562_v26, %v492_v24  ;;  %v563_v31 = vld [vmem:[#allocation7 + $0x88] sm:$0xf0]  ;;  %538 = vmatmul.msk.bf16.vlgmr.msra.gmra.mxu3 %vm294_vm0, %v776_v12  ;;  %253 = vmatpush.bf16.msra.mxu1 %v509_v21  ;;  %v497_v32 = vor.u32 %v561_v27, %v494_v28  ;;  %v480_v33 = vld [vmem:[#allocation7 + $0x60] sm:$0xf]  ;;  %v558_v36 = vld [vmem:[#allocation7 + $0x64] sm:$0xf] }
  0x18   :  { %318 = vmatpush.bf16.msrb.mxu3 %v533_v16  ;;  %v559_v34 = vld [vmem:[#allocation7 + $0x68] sm:$0xf0]  ;;  %266 = vmatpush.bf16.msra.mxu2 %v513_v25  ;;  %v501_v35 = vor.u32 %v563_v31, %v500_v30  ;;  %v482_v37 = vld [vmem:[#allocation7 + $0x6c] sm:$0xf0]  ;;  %v488_v38 = vld [vmem:[#allocation7 + $0x68] sm:$0xf] }
  0x19   :  { %v560_v39 = vld [vmem:[#allocation7 + $0x70] sm:$0xf0]  ;;  %v481_v40 = vor.u32 %v559_v34, %v480_v33  ;;  %v536_v41 = vld [vmem:[#allocation5 + $0x8] sm:$0xf]  ;;  %v485_v42 = vor.u32 %v558_v36, %v482_v37  ;;  %v468_v43 = vld [vmem:[#allocation7 + $0x48] sm:$0xf] }
  0x1a   :  { %241 = vmatpush.bf16.msra.mxu0 %v493_v29  ;;  %v556_v44 = vld [vmem:[#allocation7 + $0x50] sm:$0xf0]  ;;  %v545_v45 = vld [vmem:[#allocation5 + $0x10] sm:$0xf0]  ;;  %v489_v46 = vor.u32 %v560_v39, %v488_v38  ;;  %v555_v47 = vld [vmem:[#allocation7 + $0x4c] sm:$0xf] }
  0x1b   :  { %254 = vmatpush.bf16.msra.mxu1 %v497_v32  ;;  %v470_v48 = vld [vmem:[#allocation7 + $0x54] sm:$0xf0]  ;;  %v537_v49 = vor.u32 %v545_v45, %v536_v41  ;;  %v476_v50 = vld [vmem:[#allocation7 + $0x50] sm:$0xf]  ;;  %v557_v51 = vld [vmem:[#allocation7 + $0x58] sm:$0xf0]  ;;  %v469_v52 = vor.u32 %v556_v44, %v468_v43 }
  0x1c   :  { %267 = vmatpush.bf16.msra.mxu2 %v501_v35  ;;  %v473_v53 = vor.u32 %v555_v47, %v470_v48  ;;  %v456_v54 = vld [vmem:[#allocation7 + $0x30] sm:$0xf]  ;;  %v553_v55 = vld [vmem:[#allocation7 + $0x38] sm:$0xf0]  ;;  %v477_v56 = vor.u32 %v557_v51, %v476_v50  ;;  %v552_v57 = vld [vmem:[#allocation7 + $0x34] sm:$0xf] }
  0x1d   :  { %331 = vmatpush.bf16.msra.mxu3 %v537_v49  ;;  %v458_v58 = vld [vmem:[#allocation7 + $0x3c] sm:$0xf0]  ;;  %v464_v59 = vld [vmem:[#allocation7 + $0x38] sm:$0xf]  ;;  %v554_v60 = vld [vmem:[#allocation7 + $0x40] sm:$0xf0]  ;;  %v457_v61 = vor.u32 %v553_v55, %v456_v54 }
  0x1e   :  { %242 = vmatpush.bf16.msra.mxu0 %v481_v40  ;;  %v461_v62 = vor.u32 %v552_v57, %v458_v58  ;;  %v444_v63 = vld [vmem:[#allocation7 + $0x18] sm:$0xf]  ;;  %v550_v0 = vld [vmem:[#allocation7 + $0x20] sm:$0xf0]  ;;  %v465_v1 = vor.u32 %v554_v60, %v464_v59  ;;  %v549_v2 = vld [vmem:[#allocation7 + $0x1c] sm:$0xf] }
  0x1f   :  { %255 = vmatpush.bf16.msra.mxu1 %v485_v42  ;;  %v446_v3 = vld [vmem:[#allocation7 + $0x24] sm:$0xf0]  ;;  %v452_v4 = vld [vmem:[#allocation7 + $0x20] sm:$0xf]  ;;  %v551_v5 = vld [vmem:[#allocation7 + $0x28] sm:$0xf0]  ;;  %v445_v6 = vor.u32 %v550_v0, %v444_v63 }
  0x20   :  { %268 = vmatpush.bf16.msra.mxu2 %v489_v46  ;;  %v449_v7 = vor.u32 %v549_v2, %v446_v3  ;;  %v432_v8 = vld [vmem:[#allocation7] sm:$0xf]  ;;  %v547_v9 = vld [vmem:[#allocation7 + $0x8] sm:$0xf0]  ;;  %v453_v10 = vor.u32 %v551_v5, %v452_v4  ;;  %v546_v11 = vld [vmem:[#allocation7 + $0x4] sm:$0xf] }
  0x21   :  { %v434_v13 = vld [vmem:[#allocation7 + $0xc] sm:$0xf0]  ;;  %v440_v14 = vld [vmem:[#allocation7 + $0x8] sm:$0xf]  ;;  %v548_v15 = vld [vmem:[#allocation7 + $0x10] sm:$0xf0]  ;;  %v433_v16 = vor.u32 %v547_v9, %v432_v8 }
  0x22   :  { %243 = vmatpush.bf16.msra.mxu0 %v469_v52  ;;  %v437_v17 = vor.u32 %v546_v11, %v434_v13  ;;  %v441_v18 = vor.u32 %v548_v15, %v440_v14  ;;  %v78_v19 = vld [vmem:[%s797_s1] sm:$0xf]  ;;  %s722_s1 = smov [#allocation8]   ;;  %s723_s23 = smov [#allocation9]  }
  0x23   :  { %256 = vmatpush.bf16.msra.mxu1 %v473_v53  ;;  %v337_v23 = vld [vmem:[%s801_s5] sm:$0x7]  ;;  %s401_s5 = sshll.u32 %s722_s1, 4  ;;  %s412_s24 = sshll.u32 %s723_s23, 4  ;;  %s402_s5 = int_to_ptr.vmem [resolvable:$true] %s401_s5  ;;  %s413_s24 = int_to_ptr.vmem [resolvable:$true] %s412_s24 }
  0x24   :  { %269 = vmatpush.bf16.msra.mxu2 %v477_v56  ;;  %v340_v25 = vperm.slane %v337_v23, 1  ;;  %v341_v34 = vperm.slane %v337_v23, 2  ;;  %v339_v48 = vperm.slane %v337_v23, 0  ;;  %s414_s27 = sshll.u32 %s803_s7, 4  ;;  %s415_s27 = int_to_ptr.hbm [resolvable:$true] %s414_s27 }
  0x26   :  { %244 = vmatpush.bf16.msra.mxu0 %v457_v61 }
  0x27   :  { %539 = vmatmul.msk.bf16.vlgmr.msrb.gmra.mxu3 %vm294_vm0, %v776_v12  ;;  %257 = vmatpush.bf16.msra.mxu1 %v461_v62 }
  0x28   :  { %270 = vmatpush.bf16.msra.mxu2 %v465_v1  ;;  %v388_v1 = vld [vmem:[#allocation2] sm:$0xff] }
  0x2a   :  { %245 = vmatpush.bf16.msra.mxu0 %v445_v6 }
  0x2b   :  { %258 = vmatpush.bf16.msra.mxu1 %v449_v7 }
  0x2c   :  { %271 = vmatpush.bf16.msra.mxu2 %v453_v10 }
  0x2e   :  { %246 = vmatpush.bf16.msra.mxu0 %v433_v16 }
  0x2f   :  { %259 = vmatpush.bf16.msra.mxu1 %v437_v17 }
  0x30   :  { %272 = vmatpush.bf16.msra.mxu2 %v441_v18 }
  0x31   :  { %247 = vmatmul.bf16.vlgmr.msra.gmra.mxu0 %v78_v19 }
  0x32   :  { %260 = vmatmul.bf16.vlgmr.msra.gmra.mxu1 %v78_v19 }
  0x33   :  { %273 = vmatmul.bf16.vlgmr.msra.gmra.mxu2 %v78_v19 }
  0x37   :  { %540 = vmatmul.msk.bf16.vlgmr.msra.gmra.mxu3 %vm294_vm0, %v776_v12 }
  0x9a   :  { %v307_v20 = vpop.f32.mrf.mxu3 }
  0xa2   :  { %v309_v21 = vpop.f32.mrf.mxu3 }
  0xaa   :  { %v320_v22 = vpop.f32.mrf.mxu3 }
  0xae   :  { %v248_v24 = vpop.f32.mrf.mxu0 }
  0xaf   :  { %v261_v26 = vpop.f32.mrf.mxu1  ;;  %v308_v47 = vadd.f32 %v307_v20, %v248_v24 }
  0xb0   :  { %v321_v27 = vadd.f32 %v320_v22, %v261_v26 }
  0xb1   :  { %v345_v51 = vadd.f32 %v339_v48, %v308_v47 }
  0xb2   :  { %v346_v28 = vadd.f32 %v340_v25, %v321_v27  ;;  %v322_v29 = vpop.f32.mrf.mxu3 }
  0xb4   :  { %v541_v30 = vmul.f32 -1.442695, %v346_v28 }
  0xb6   :  { %577 = vpow2.f32 %v541_v30  ;;  %v274_v31 = vpop.f32.mrf.mxu2  ;;  %v250_v32 = vpop.f32.mrf.mxu0 }
  0xb7   :  { %v263_v33 = vpop.f32.mrf.mxu1 }
  0xba   :  { %v333_v12 = vpop.f32.mrf.mxu3 }
  0xbb   :  { %v334_v35 = vadd.f32 %v333_v12, %v274_v31 }
  0xbc   :  { %v578_v36 = vpop.eup %577 }
  0xbd   :  { %v352_v37 = vadd.f32 1.0, %v578_v36  ;;  %v347_v38 = vadd.f32 %v341_v34, %v334_v35 }
  0xbe   :  { %v276_v39 = vpop.f32.mrf.mxu2 }
  0xbf   :  { %579 = vrcp.f32 %v352_v37  ;;  %v542_v40 = vmul.f32 -1.442695, %v347_v38  ;;  %v364_v54 = vand.u32 2147483648, %v352_v37  ;;  %vm358_vm2 = vweird.f32 %v352_v37 }
  0xc0   :  { %v362_v56 = vand.u32 2147483647, %v352_v37 }
  0xc1   :  { %581 = vpow2.f32 %v542_v40  ;;  %v365_v61 = vor.u32 1.1754944e-38, %v364_v54 }
  0xc2   :  { %v335_v41 = vpop.f32.mrf.mxu3  ;;  %vm363_vm5 = vcmp.eq.f32.partialorder %v362_v56, 8.507059e+37 }
  0xc5   :  { %v580_v42 = vpop.eup %579 }
  0xc6   :  { %v354_v43 = vmul.f32 %v580_v42, %v352_v37  ;;  %vm359_vm1 = vweird.f32 %v580_v42 }
  0xc7   :  { %v582_v44 = vpop.eup %581  ;;  %vm360_vm3 = vmor %vm358_vm2, %vm359_vm1 }
  0xc8   :  { %v371_v45 = vadd.f32 1.0, %v582_v44  ;;  %v355_v46 = vsub.f32 1.0, %v354_v43 }
  0xca   :  { %583 = vrcp.f32 %v371_v45  ;;  %v356_v49 = vmul.f32 %v580_v42, %v355_v46  ;;  %v383_v57 = vand.u32 2147483648, %v371_v45  ;;  %v381_v60 = vand.u32 2147483647, %v371_v45 }
  0xcb   :  { %585 = vtanh.f32 %v345_v51  ;;  %vm377_vm6 = vweird.f32 %v371_v45 }
  0xcc   :  { %v357_v53 = vadd.f32 %v580_v42, %v356_v49  ;;  %v384_v0 = vor.u32 1.1754944e-38, %v383_v57  ;;  %vm382_vm8 = vcmp.eq.f32.partialorder %v381_v60, 8.507059e+37 }
  0xce   :  { %v361_v58 = vsel %vm360_vm3, %v580_v42, %v357_v53 }
  0xcf   :  { %v366_v63 = vsel %vm363_vm5, %v365_v61, %v361_v58 }
  0xd0   :  { %v584_v50 = vpop.eup %583 }
  0xd1   :  { %v373_v52 = vmul.f32 %v584_v50, %v371_v45  ;;  %vm378_vm4 = vweird.f32 %v584_v50  ;;  %v586_v3 = vpop.eup %585 }
  0xd2   :  { %vm379_vm7 = vmor %vm377_vm6, %vm378_vm4  ;;  %v387_v5 = vmul.f32 %v586_v3, %v366_v63 }
  0xd3   :  { %v374_v55 = vsub.f32 1.0, %v373_v52 }
  0xd5   :  { %v375_v59 = vmul.f32 %v584_v50, %v374_v55 }
  0xd7   :  { %v376_v62 = vadd.f32 %v584_v50, %v375_v59 }
  0xd9   :  { %v380_v2 = vsel %vm379_vm7, %v584_v50, %v376_v62 }
  0xda   :  { %v385_v4 = vsel %vm382_vm8, %v384_v0, %v380_v2 }
  0xdb   :  { %v389_v6 = vmul.f32 %v388_v1, %v385_v4 }
  0xdd   :  { %v390_v7 = vadd.f32 %v389_v6, %v387_v5 }
  0xdf   :  { %587 = vtanh.f32 %v390_v7  ;;  %393 = vst [vmem:[#allocation8] sm:$0xff] %v390_v7 }
  0xe0   :  { %406 = dma.vmem_to_hbm [thread:$0]  %s402_s5, 128, %s404_s22, [#allocation4]  }
  0xe5   :  { %v588_v8 = vpop.eup %587 }
  0xe6   :  { %v392_v9 = vmul.f32 %v588_v8, %v385_v4 }
  0xe8   :  { %v394_v10 = vpack.c.bf16 %v392_v9, %v392_v9 }
  0xea   :  { %395 = vst [vmem:[#allocation9] sm:$0xf] %v394_v10 }
  0xeb   :  { %417 = dma.vmem_to_hbm [thread:$0]  %s413_s24, 64, %s415_s27, [#allocation10]  }
  0xec   :  { %713 = dma.done.wait [#allocation4], 128  }
  0xed   :  { %714 = vsyncadd [#allocation4], 4294967168 }
  0xee   :  { %715 = dma.done.wait [#allocation10], 64  }
  0xef   :  { %716 = vsyncadd [#allocation10], 4294967232 }
  0xf0   :  { %426 = vsyncpa [#allocation3], 1 }
  0xf1   :  { %427 = vsyncpa [#allocation6], 1 }
  0xf2   :  { %428 = vsyncpa [#allocation4], 1 }
  0xf3   :  { %429 = vsyncpa [#allocation10], 1 }

</bundles_post_ra>
